<compile_context>
chip_gen: v6e
topology: v6e:2x2x1
jax: 0.10.0
libtpu: 0.0.40
codegen_flags: <defaults>
</compile_context>

<pallas_src>
import functools

import jax
import jax.numpy as jnp
from jax.experimental import pallas as pl
from jax.experimental.pallas import tpu as pltpu

HIDDEN_DIM = 128
BN_EPS = 1e-5


def _round_up(n, m):
    return ((n + m - 1) // m) * m


# --------------------------------------------------------------------------
# Kernel
# --------------------------------------------------------------------------
def continuous_field_kernel(
    x_ref,       # (tile, input_dim)  f32   (cast to matmul dtype in-kernel)
    w1_ref,      # (input_dim, H)     compute dtype
    b1_ref,      # (1, H)             f32
    w2_ref,      # (H, H)             compute dtype (BN1 folded in)
    b2_ref,      # (1, H)             f32           (BN1 folded in)
    wh_ref,      # (H, 2*out)         compute dtype (BN2 folded, heads concat)
    bh_ref,      # (1, 2*out)         f32           (BN2 folded, heads concat)
    dist_ref,    # (tile, out)        softplus(distance logits)
    conf_ref,    # (tile, out)        sigmoid(confidence logits)
    *,
    output_dim,
):
    # In-kernel cast: x travels HBM->VMEM as f32 (4 B/elem once) and is
    # truncated to the MXU dtype right before the first matmul.
    x = x_ref[...].astype(w1_ref.dtype)

    # shared block 1: Linear -> ReLU   (BN1 folded into w2/b2, Dropout = id)
    h = jnp.dot(x, w1_ref[...], preferred_element_type=jnp.float32) + b1_ref[...]
    h = jnp.maximum(h, 0.0).astype(w2_ref.dtype)

    # shared block 2: Linear(+BN1) -> ReLU   (BN2 folded into head weights)
    h = jnp.dot(h, w2_ref[...], preferred_element_type=jnp.float32) + b2_ref[...]
    h = jnp.maximum(h, 0.0).astype(wh_ref.dtype)

    # fused heads: one matmul producing [distance logits | confidence logits]
    y = jnp.dot(h, wh_ref[...], preferred_element_type=jnp.float32) + bh_ref[...]
    yd = y[:, :output_dim]
    yc = y[:, output_dim:]

    # Softplus (torch default threshold=20) on the distance half.
    # log(1+e) instead of log1p: error < 6e-8 absolute, always lowers cleanly.
    ed = jnp.exp(jnp.minimum(yd, 20.0))
    dist_ref[...] = jnp.where(yd > 20.0, yd, jnp.log(1.0 + ed)).astype(dist_ref.dtype)

    # Exact sigmoid on the confidence half (exp(-y)->inf gives 1/inf == 0).
    conf_ref[...] = (1.0 / (1.0 + jnp.exp(-yc))).astype(conf_ref.dtype)


# --------------------------------------------------------------------------
# Parameter preparation (call ONCE, outside the per-step path)
# --------------------------------------------------------------------------
def fold_params(params, compute_dtype=jnp.bfloat16):
    """Fold eval-mode BatchNorm into the downstream Linears, fuse the two
    heads into one (H, 2*out) weight, and cast matmul operands once."""
    def bn_fold(g, b, m, v):
        scale = g / jnp.sqrt(v + BN_EPS)
        return scale, b - m * scale

    s1, t1 = bn_fold(params["bn1_g"], params["bn1_b"],
                     params["bn1_m"], params["bn1_v"])
    s2, t2 = bn_fold(params["bn2_g"], params["bn2_b"],
                     params["bn2_m"], params["bn2_v"])

    # (relu(xW1+b1)*s1 + t1) @ W2 + b2 == relu(xW1+b1) @ (s1[:,None]*W2) + (t1@W2+b2)
    w2f = params["w2"] * s1[:, None]
    b2f = params["b2"] + t1 @ params["w2"]
    wd_f = params["wd"] * s2[:, None]
    bd_f = params["bd"] + t2 @ params["wd"]
    wc_f = params["wc"] * s2[:, None]
    bc_f = params["bc"] + t2 @ params["wc"]

    wh = jnp.concatenate([wd_f, wc_f], axis=1)          # (H, 2*out)
    bh = jnp.concatenate([bd_f, bc_f], axis=0)          # (2*out,)

    return dict(
        w1=params["w1"].astype(compute_dtype),
        b1=params["b1"].reshape(1, -1).astype(jnp.float32),
        w2=w2f.astype(compute_dtype),
        b2=b2f.reshape(1, -1).astype(jnp.float32),
        wh=wh.astype(compute_dtype),
        bh=bh.reshape(1, -1).astype(jnp.float32),
    )


def _default_batch_tile(B, input_dim, output_dim):
    # Per-row VMEM bytes for double-buffered f32 x block + two f32 out blocks.
    row_bytes = 2 * 4 * (input_dim + 2 * output_dim)
    cap = max(256, (24 << 20) // max(row_bytes, 1))   # keep blocks << 64 MiB (v7x)
    target = min(4096, cap)
    if B >= 1024:
        # grid >= 2 so v7x's second TensorCore gets work under ("parallel",).
        n_blocks = max(2, pl.cdiv(B, target))
    else:
        n_blocks = pl.cdiv(B, target)
    return _round_up(pl.cdiv(B, n_blocks), 16)


# --------------------------------------------------------------------------
# Wrapper
# --------------------------------------------------------------------------
def continuous_field_output(x, folded, *, batch_tile=None, out_dtype=jnp.float32):
    """Forward pass (eval mode). Returns (distances, confidence), each (B, out)."""
    B, input_dim = x.shape
    H = folded["w1"].shape[1]
    two_out = folded["wh"].shape[1]
    output_dim = two_out // 2

    if batch_tile is None:
        batch_tile = _default_batch_tile(B, input_dim, output_dim)
    batch_tile = max(16, _round_up(batch_tile, 16))     # bf16 sublane packing

    grid_n = pl.cdiv(B, batch_tile)
    B_pad = grid_n * batch_tile
    # Padding only happens when the tile does not divide B (default tile
    # selection avoids it for 16-aligned batches).
    x_in = x if B_pad == B else jnp.pad(x, ((0, B_pad - B), (0, 0)))

    full = lambda shape: pl.BlockSpec(shape, lambda i: (0, 0))
    row_spec = lambda cols: pl.BlockSpec((batch_tile, cols), lambda i: (i, 0))

    dist, conf = pl.pallas_call(
        functools.partial(continuous_field_kernel, output_dim=output_dim),
        out_shape=(
            jax.ShapeDtypeStruct((B_pad, output_dim), out_dtype),
            jax.ShapeDtypeStruct((B_pad, output_dim), out_dtype),
        ),
        grid_spec=pltpu.PrefetchScalarGridSpec(
            num_scalar_prefetch=0,
            grid=(grid_n,),
            in_specs=[
                row_spec(input_dim),
                full((input_dim, H)), full((1, H)),
                full((H, H)), full((1, H)),
                full((H, two_out)), full((1, two_out)),
            ],
            out_specs=[row_spec(output_dim), row_spec(output_dim)],
        ),
        compiler_params=pltpu.CompilerParams(
            dimension_semantics=("parallel",),
            # Default scoped limit (16/32 MiB) is too small for large batch
            # tiles; 48 MiB stays safely within v7x's 64 MiB physical VMEM.
            vmem_limit_bytes=48 * 1024 * 1024,
        ),
    )(x_in, folded["w1"], folded["b1"], folded["w2"], folded["b2"],
      folded["wh"], folded["bh"])

    if B_pad != B:
        dist, conf = dist[:B], conf[:B]
    return dist, conf


# --------------------------------------------------------------------------
# Init / reference / test
# --------------------------------------------------------------------------
def init_params(key, input_dim, output_dim):
    """Deterministic init mimicking PyTorch defaults (weights stored (in, out))."""
    H = HIDDEN_DIM
    keys = jax.random.split(key, 12)

    def linear(kw, kb, fan_in, fan_out):
        bound = 1.0 / jnp.sqrt(fan_in)
        w = jax.random.uniform(kw, (fan_in, fan_out), jnp.float32, -bound, bound)
        b = jax.random.uniform(kb, (fan_out,), jnp.float32, -bound, bound)
        return w, b

    w1, b1 = linear(keys[0], keys[1], input_dim, H)
    w2, b2 = linear(keys[2], keys[3], H, H)
    wd, bd = linear(keys[4], keys[5], H, output_dim)
    wc, bc = linear(keys[6], keys[7], H, output_dim)

    # Non-trivial (deterministic) BN params so the fold path is exercised.
    bn1_g = 1.0 + 0.1 * jax.random.normal(keys[8], (H,), jnp.float32)
    bn1_b = 0.1 * jax.random.normal(keys[9], (H,), jnp.float32)
    bn1_m = 0.05 * jax.random.normal(keys[10], (H,), jnp.float32)
    bn1_v = jnp.abs(1.0 + 0.1 * jax.random.normal(keys[11], (H,), jnp.float32))
    bn2_g = 1.0 + 0.05 * jax.random.normal(keys[8], (H,), jnp.float32)
    bn2_b = 0.05 * jax.random.normal(keys[9], (H,), jnp.float32)
    bn2_m = 0.02 * jax.random.normal(keys[10], (H,), jnp.float32)
    bn2_v = jnp.abs(1.0 + 0.05 * jax.random.normal(keys[11], (H,), jnp.float32))

    return dict(
        w1=w1, b1=b1, w2=w2, b2=b2, wd=wd, bd=bd, wc=wc, bc=bc,
        bn1_g=bn1_g, bn1_b=bn1_b, bn1_m=bn1_m, bn1_v=bn1_v,
        bn2_g=bn2_g, bn2_b=bn2_b, bn2_m=bn2_m, bn2_v=bn2_v,
    )


def _reference(x, params):
    """Pure-JAX f32 reference (eval-mode forward)."""
    def bn(h, g, b, m, v):
        return (h - m) / jnp.sqrt(v + BN_EPS) * g + b

    h = jnp.maximum(x @ params["w1"] + params["b1"], 0.0)
    h = bn(h, params["bn1_g"], params["bn1_b"], params["bn1_m"], params["bn1_v"])
    h = jnp.maximum(h @ params["w2"] + params["b2"], 0.0)
    h = bn(h, params["bn2_g"], params["bn2_b"], params["bn2_m"], params["bn2_v"])
    d = jax.nn.softplus(h @ params["wd"] + params["bd"])
    c = jax.nn.sigmoid(h @ params["wc"] + params["bc"])
    return d, c


if __name__ == "__main__":
    key = jax.random.PRNGKey(0)
    k_param, k_x = jax.random.split(key)

    batch, input_dim, output_dim = 16, 32, 16
    params = init_params(k_param, input_dim, output_dim)
    x = jax.random.normal(k_x, (batch, input_dim), jnp.float32)

    d_ref, c_ref = _reference(x, params)

    # f32-operand path: checks the BN fold / fused-head / tiling structure.
    # (Tolerance leaves headroom for MXU f32 pass decomposition on hardware.)
    folded32 = fold_params(params, compute_dtype=jnp.float32)
    d32, c32 = continuous_field_output(x, folded32, batch_tile=16)
    jax.block_until_ready((d32, c32))
    assert d32.shape == (batch, output_dim) and c32.shape == (batch, output_dim)
    assert jnp.allclose(d32, d_ref, atol=2e-2, rtol=2e-2)
    assert jnp.allclose(c32, c_ref, atol=2e-2, rtol=2e-2)

    # Default path: bf16 matmul operands, f32 accumulation, jitted wrapper.
    folded = fold_params(params)
    fwd = jax.jit(continuous_field_output)
    dist, conf = fwd(x, folded)
    jax.block_until_ready((dist, conf))
    assert dist.shape == (batch, output_dim) and conf.shape == (batch, output_dim)
    assert jnp.allclose(dist, d_ref, atol=5e-2, rtol=5e-2)
    assert jnp.allclose(conf, c_ref, atol=5e-2, rtol=5e-2)

    print("KERNEL_OK")
</pallas_src>

<mosaic_0001>
module attributes {stable_mosaic.version = 11 : i64} {
  func.func @continuous_field_kernel(%arg0: i32, %arg1: memref<16x32xf32, #tpu.memory_space<vmem>>, %arg2: memref<32x128xf32, #tpu.memory_space<vmem>>, %arg3: memref<1x128xf32, #tpu.memory_space<vmem>>, %arg4: memref<128x128xf32, #tpu.memory_space<vmem>>, %arg5: memref<1x128xf32, #tpu.memory_space<vmem>>, %arg6: memref<128x32xf32, #tpu.memory_space<vmem>>, %arg7: memref<1x32xf32, #tpu.memory_space<vmem>>, %arg8: memref<16x16xf32, #tpu.memory_space<vmem>>, %arg9: memref<16x16xf32, #tpu.memory_space<vmem>>) attributes {dimension_semantics = [#tpu.dimension_semantics<parallel>], iteration_bounds = array<i64: 1>, scalar_prefetch = 0 : i64, scratch_operands = 0 : i64, tpu.core_type = #tpu.core_type<tc>, window_params = [{transform_indices = @transform_0, window_bounds = array<i64: 16, 32>}, {pipeline_mode = #tpu.pipeline_mode<synchronous>, transform_indices = @transform_1, window_bounds = array<i64: 32, 128>}, {pipeline_mode = #tpu.pipeline_mode<synchronous>, transform_indices = @transform_2, window_bounds = array<i64: 1, 128>}, {pipeline_mode = #tpu.pipeline_mode<synchronous>, transform_indices = @transform_3, window_bounds = array<i64: 128, 128>}, {pipeline_mode = #tpu.pipeline_mode<synchronous>, transform_indices = @transform_4, window_bounds = array<i64: 1, 128>}, {pipeline_mode = #tpu.pipeline_mode<synchronous>, transform_indices = @transform_5, window_bounds = array<i64: 128, 32>}, {pipeline_mode = #tpu.pipeline_mode<synchronous>, transform_indices = @transform_6, window_bounds = array<i64: 1, 32>}, {transform_indices = @transform_7, window_bounds = array<i64: 16, 16>}, {transform_indices = @transform_8, window_bounds = array<i64: 16, 16>}]} {
    %c0 = arith.constant 0 : index
    %c0_0 = arith.constant 0 : index
    %0 = vector.load %arg1[%c0, %c0_0] : memref<16x32xf32, #tpu.memory_space<vmem>>, vector<16x32xf32>
    %c0_1 = arith.constant 0 : index
    %c0_2 = arith.constant 0 : index
    %1 = vector.load %arg2[%c0_1, %c0_2] : memref<32x128xf32, #tpu.memory_space<vmem>>, vector<32x128xf32>
    %cst = arith.constant dense<0.000000e+00> : vector<16x128xf32>
    %2 = tpu.matmul %0, %1, %cst {dimension_numbers = #tpu.dot_dimension_numbers<[1], [0], [0], [1], [0, 0, 1, 1], [], []>} : vector<16x32xf32>, vector<32x128xf32>, vector<16x128xf32> -> vector<16x128xf32>
    %c0_3 = arith.constant 0 : index
    %c0_4 = arith.constant 0 : index
    %3 = vector.load %arg3[%c0_3, %c0_4] : memref<1x128xf32, #tpu.memory_space<vmem>>, vector<1x128xf32>
    %4 = vector.broadcast %3 : vector<1x128xf32> to vector<16x128xf32>
    %5 = arith.addf %2, %4 : vector<16x128xf32>
    %cst_5 = arith.constant 0.000000e+00 : f32
    %6 = vector.broadcast %cst_5 : f32 to vector<16x128xf32>
    %7 = arith.maximumf %5, %6 : vector<16x128xf32>
    %c0_6 = arith.constant 0 : index
    %c0_7 = arith.constant 0 : index
    %8 = vector.load %arg4[%c0_6, %c0_7] : memref<128x128xf32, #tpu.memory_space<vmem>>, vector<128x128xf32>
    %cst_8 = arith.constant dense<0.000000e+00> : vector<16x128xf32>
    %9 = tpu.matmul %7, %8, %cst_8 {dimension_numbers = #tpu.dot_dimension_numbers<[1], [0], [0], [1], [0, 0, 1, 1], [], []>} : vector<16x128xf32>, vector<128x128xf32>, vector<16x128xf32> -> vector<16x128xf32>
    %c0_9 = arith.constant 0 : index
    %c0_10 = arith.constant 0 : index
    %10 = vector.load %arg5[%c0_9, %c0_10] : memref<1x128xf32, #tpu.memory_space<vmem>>, vector<1x128xf32>
    %11 = vector.broadcast %10 : vector<1x128xf32> to vector<16x128xf32>
    %12 = arith.addf %9, %11 : vector<16x128xf32>
    %cst_11 = arith.constant 0.000000e+00 : f32
    %13 = vector.broadcast %cst_11 : f32 to vector<16x128xf32>
    %14 = arith.maximumf %12, %13 : vector<16x128xf32>
    %c0_12 = arith.constant 0 : index
    %c0_13 = arith.constant 0 : index
    %15 = vector.load %arg6[%c0_12, %c0_13] : memref<128x32xf32, #tpu.memory_space<vmem>>, vector<128x32xf32>
    %cst_14 = arith.constant dense<0.000000e+00> : vector<16x32xf32>
    %16 = tpu.matmul %14, %15, %cst_14 {dimension_numbers = #tpu.dot_dimension_numbers<[1], [0], [0], [1], [0, 0, 1, 1], [], []>} : vector<16x128xf32>, vector<128x32xf32>, vector<16x32xf32> -> vector<16x32xf32>
    %c0_15 = arith.constant 0 : index
    %c0_16 = arith.constant 0 : index
    %17 = vector.load %arg7[%c0_15, %c0_16] : memref<1x32xf32, #tpu.memory_space<vmem>>, vector<1x32xf32>
    %18 = vector.broadcast %17 : vector<1x32xf32> to vector<16x32xf32>
    %19 = arith.addf %16, %18 : vector<16x32xf32>
    %20 = vector.extract_strided_slice %19 {offsets = [0, 0], sizes = [16, 16], strides = [1, 1]} : vector<16x32xf32> to vector<16x16xf32>
    %21 = vector.extract_strided_slice %19 {offsets = [0, 16], sizes = [16, 16], strides = [1, 1]} : vector<16x32xf32> to vector<16x16xf32>
    %cst_17 = arith.constant 2.000000e+01 : f32
    %22 = vector.broadcast %cst_17 : f32 to vector<16x16xf32>
    %23 = arith.minimumf %20, %22 : vector<16x16xf32>
    %24 = math.exp %23 : vector<16x16xf32>
    %cst_18 = arith.constant 2.000000e+01 : f32
    %25 = vector.broadcast %cst_18 : f32 to vector<16x16xf32>
    %26 = arith.cmpf ogt, %20, %25 : vector<16x16xf32>
    %cst_19 = arith.constant 1.000000e+00 : f32
    %27 = vector.broadcast %cst_19 : f32 to vector<16x16xf32>
    %28 = arith.addf %27, %24 : vector<16x16xf32>
    %29 = math.log %28 : vector<16x16xf32>
    %30 = arith.select %26, %20, %29 : vector<16x16xi1>, vector<16x16xf32>
    %c0_20 = arith.constant 0 : index
    %c0_21 = arith.constant 0 : index
    %31 = vector.load %arg8[%c0_20, %c0_21] : memref<16x16xf32, #tpu.memory_space<vmem>>, vector<16x16xf32>
    tpu.vector_store %arg8[%c0_20, %c0_21], %30 {strides = array<i32>} : memref<16x16xf32, #tpu.memory_space<vmem>>, vector<16x16xf32>,
    %cst_22 = arith.constant 0.000000e+00 : f32
    %32 = vector.broadcast %cst_22 : f32 to vector<16x16xf32>
    %33 = arith.subf %32, %21 : vector<16x16xf32>
    %34 = math.exp %33 : vector<16x16xf32>
    %cst_23 = arith.constant 1.000000e+00 : f32
    %35 = vector.broadcast %cst_23 : f32 to vector<16x16xf32>
    %36 = arith.addf %35, %34 : vector<16x16xf32>
    %cst_24 = arith.constant 1.000000e+00 : f32
    %37 = vector.broadcast %cst_24 : f32 to vector<16x16xf32>
    %38 = arith.divf %37, %36 : vector<16x16xf32>
    %c0_25 = arith.constant 0 : index
    %c0_26 = arith.constant 0 : index
    %39 = vector.load %arg9[%c0_25, %c0_26] : memref<16x16xf32, #tpu.memory_space<vmem>>, vector<16x16xf32>
    tpu.vector_store %arg9[%c0_25, %c0_26], %38 {strides = array<i32>} : memref<16x16xf32, #tpu.memory_space<vmem>>, vector<16x16xf32>,
    return
  }
  func.func @transform_0(%arg0: i32) -> (i32, i32) {
    %c0_i32 = arith.constant 0 : i32
    %c0_i32_0 = arith.constant 0 : i32
    return %arg0, %c0_i32 : i32, i32
  }
  func.func @transform_1(%arg0: i32) -> (i32, i32) {
    %c0_i32 = arith.constant 0 : i32
    %c0_i32_0 = arith.constant 0 : i32
    %c0_i32_1 = arith.constant 0 : i32
    return %c0_i32, %c0_i32_0 : i32, i32
  }
  func.func @transform_2(%arg0: i32) -> (i32, i32) {
    %c0_i32 = arith.constant 0 : i32
    %c0_i32_0 = arith.constant 0 : i32
    %c0_i32_1 = arith.constant 0 : i32
    return %c0_i32, %c0_i32_0 : i32, i32
  }
  func.func @transform_3(%arg0: i32) -> (i32, i32) {
    %c0_i32 = arith.constant 0 : i32
    %c0_i32_0 = arith.constant 0 : i32
    %c0_i32_1 = arith.constant 0 : i32
    return %c0_i32, %c0_i32_0 : i32, i32
  }
  func.func @transform_4(%arg0: i32) -> (i32, i32) {
    %c0_i32 = arith.constant 0 : i32
    %c0_i32_0 = arith.constant 0 : i32
    %c0_i32_1 = arith.constant 0 : i32
    return %c0_i32, %c0_i32_0 : i32, i32
  }
  func.func @transform_5(%arg0: i32) -> (i32, i32) {
    %c0_i32 = arith.constant 0 : i32
    %c0_i32_0 = arith.constant 0 : i32
    %c0_i32_1 = arith.constant 0 : i32
    return %c0_i32, %c0_i32_0 : i32, i32
  }
  func.func @transform_6(%arg0: i32) -> (i32, i32) {
    %c0_i32 = arith.constant 0 : i32
    %c0_i32_0 = arith.constant 0 : i32
    %c0_i32_1 = arith.constant 0 : i32
    return %c0_i32, %c0_i32_0 : i32, i32
  }
  func.func @transform_7(%arg0: i32) -> (i32, i32) {
    %c0_i32 = arith.constant 0 : i32
    %c0_i32_0 = arith.constant 0 : i32
    return %arg0, %c0_i32 : i32, i32
  }
  func.func @transform_8(%arg0: i32) -> (i32, i32) {
    %c0_i32 = arith.constant 0 : i32
    %c0_i32_0 = arith.constant 0 : i32
    return %arg0, %c0_i32 : i32, i32
  }
}

</mosaic_0001>

<bundles_post_ra>
// kernel: tpu_custom_call.1
= control target key start
LH: loop header
LB: loop body
LE: loop exit
PB: predicated region body
PF: predicated region fallthrough
CT: control target
= control target key end

     0   :  { %14 = vsyncpa [#allocation3], 0  ;;  %s821_s0 = inlined_call_operand.hbm [shape: f32[16,32], index: 0, kind: input, shape index: {}]   ;;  %s822_s1 = inlined_call_operand.vmem [shape: f32[32,128], index: 1, kind: input, shape index: {}]   ;;  %s823_s2 = inlined_call_operand.vmem [shape: f32[1,128], index: 2, kind: input, shape index: {}]   ;;  %s824_s3 = inlined_call_operand.vmem [shape: f32[128,128], index: 3, kind: input, shape index: {}]   ;;  %s825_s4 = inlined_call_operand.vmem [shape: f32[1,128], index: 4, kind: input, shape index: {}]   ;;  %s826_s5 = inlined_call_operand.vmem [shape: f32[128,32], index: 5, kind: input, shape index: {}]   ;;  %s827_s6 = inlined_call_operand.vmem [shape: f32[1,32], index: 6, kind: input, shape index: {}]   ;;  %s828_s7 = inlined_call_operand.hbm [shape: f32[16,16], index: 7, kind: output, shape index: {0}]   ;;  %s829_s8 = inlined_call_operand.hbm [shape: f32[16,16], index: 8, kind: output, shape index: {1}]  }
   0x1   :  { %15 = vsyncpa [#allocation4], 0 }
   0x2   :  { %16 = vsyncpa [#allocation7], 0  ;;  %s629_s27 = smov [#allocation2]  }
   0x3   :  { %s22_s28 = sshll.u32 %s629_s27, 4  ;;  %s23_s28 = int_to_ptr.vmem [resolvable:$true] %s22_s28 }
   0x4   :  { %s571_s29 = scalar_lea.vmem %s23_s28, 256  ;;  %p576_p1 = scmp.lt.s32.totalorder %s23_s28, %s23_s28 }
   0x5   :  { %p572_p0 = scmp.ne.s32.totalorder %s23_s28, %s571_s29  ;;  %p577_p2 = scmp.lt.s32.totalorder %s571_s29, %s571_s29 }
   0x7   :  { %p578_p3 = por %p577_p2, %p576_p1 }
   0x9   :  { %p579_p4 = pnand %p578_p3, %p572_p0 }
   0xb   :  { %582 = shalt.err (!%p579_p4)
}
   0xc   :  { %s630_s30 = smov 128   ;;  %s631_s9 = smov 8  }
   0xd   :  { %28 = dma.hbm_to_vmem [thread:$0]  %s821_s0, 256, %s23_s28, [#allocation3], %s630_s30, %s630_s30, %s631_s9  }
   0xe   :  { %623 = dma.done.wait [#allocation3], 256  }
   0xf   :  { %624 = vsyncadd [#allocation3], 4294967040  ;;  %vm57_vm0 = vcmask 261120   ;;  %v49_v0 = vld [vmem:[%s822_s1 + $0x18] sm:$0xff]  ;;  %v48_v1 = vld [vmem:[%s822_s1 + $0x10] sm:$0xff]  ;;  %vm355_vm1 = vcmask 130048  }
  0x10   :  { %460 = vmatprep.subr.mxu0 %v49_v0  ;;  %v44_v2 = vld [vmem:[#allocation2] sm:$0xff]  ;;  %v47_v3 = vld [vmem:[%s822_s1 + $0x8] sm:$0xff]  ;;  %v156_v4 = vld [vmem:[%s824_s3 + $0x78] sm:$0xff] }
  0x11   :  { %461 = vmatpush3.msra.mxu0 %v49_v0  ;;  %468 = vmatprep.mubr.msk.f32.mxu0 %vm57_vm0, %v44_v2  ;;  %v155_v5 = vld [vmem:[%s824_s3 + $0x70] sm:$0xff]  ;;  %v46_v6 = vld [vmem:[%s822_s1] sm:$0xff]  ;;  %v154_v7 = vld [vmem:[%s824_s3 + $0x68] sm:$0xff] }
  0x12   :  { %462 = vmatprep.subr.mxu0 %v48_v1  ;;  %471 = vmatprep.subr.mxu1 %v156_v4  ;;  %v45_v8 = vld [vmem:[#allocation2 + $0x8] sm:$0xff]  ;;  %v153_v9 = vld [vmem:[%s824_s3 + $0x60] sm:$0xff]  ;;  %v152_v10 = vld [vmem:[%s824_s3 + $0x58] sm:$0xff] }
  0x13   :  { %463 = vmatpush3.msra.mxu0 %v48_v1  ;;  %472 = vmatpush3.msra.mxu1 %v156_v4  ;;  %v151_v11 = vld [vmem:[%s824_s3 + $0x50] sm:$0xff]  ;;  %v150_v12 = vld [vmem:[%s824_s3 + $0x48] sm:$0xff]  ;;  %v149_v13 = vld [vmem:[%s824_s3 + $0x40] sm:$0xff] }
  0x14   :  { %464 = vmatprep.subr.mxu0 %v47_v3  ;;  %473 = vmatprep.subr.mxu1 %v155_v5  ;;  %v148_v14 = vld [vmem:[%s824_s3 + $0x38] sm:$0xff]  ;;  %v147_v15 = vld [vmem:[%s824_s3 + $0x30] sm:$0xff]  ;;  %v146_v16 = vld [vmem:[%s824_s3 + $0x28] sm:$0xff] }
  0x15   :  { %465 = vmatpush3.msra.mxu0 %v47_v3  ;;  %474 = vmatpush3.msra.mxu1 %v155_v5  ;;  %v145_v17 = vld [vmem:[%s824_s3 + $0x20] sm:$0xff]  ;;  %v144_v18 = vld [vmem:[%s824_s3 + $0x18] sm:$0xff]  ;;  %v143_v19 = vld [vmem:[%s824_s3 + $0x10] sm:$0xff] }
  0x16   :  { %466 = vmatprep.subr.mxu0 %v46_v6  ;;  %475 = vmatprep.subr.mxu1 %v154_v7  ;;  %v142_v20 = vld [vmem:[%s824_s3 + $0x8] sm:$0xff]  ;;  %v141_v21 = vld [vmem:[%s824_s3] sm:$0xff]  ;;  %v256_v22 = vld [vmem:[%s826_s5 + $0x78] sm:$0xff] }
  0x17   :  { %467 = vmatpush3.msra.mxu0 %v46_v6  ;;  %476 = vmatpush3.msra.mxu1 %v154_v7  ;;  %v255_v23 = vld [vmem:[%s826_s5 + $0x70] sm:$0xff]  ;;  %v254_v24 = vld [vmem:[%s826_s5 + $0x68] sm:$0xff]  ;;  %v253_v25 = vld [vmem:[%s826_s5 + $0x60] sm:$0xff] }
  0x18   :  { %469 = vmatmul.mubr.msk.f32.vlgmr.msra.gmra.mxu0 %vm57_vm0, %v45_v8  ;;  %477 = vmatprep.subr.mxu1 %v153_v9  ;;  %v252_v26 = vld [vmem:[%s826_s5 + $0x58] sm:$0xff]  ;;  %v251_v27 = vld [vmem:[%s826_s5 + $0x50] sm:$0xff]  ;;  %v250_v28 = vld [vmem:[%s826_s5 + $0x48] sm:$0xff] }
  0x19   :  { %478 = vmatpush3.msra.mxu1 %v153_v9  ;;  %506 = vmatprep.subr.mxu0 %v256_v22  ;;  %v249_v29 = vld [vmem:[%s826_s5 + $0x40] sm:$0xff]  ;;  %v248_v30 = vld [vmem:[%s826_s5 + $0x38] sm:$0xff]  ;;  %v247_v31 = vld [vmem:[%s826_s5 + $0x30] sm:$0xff] }
  0x1a   :  { %479 = vmatprep.subr.mxu1 %v152_v10  ;;  %507 = vmatpush3.msra.mxu0 %v256_v22  ;;  %v246_v32 = vld [vmem:[%s826_s5 + $0x28] sm:$0xff]  ;;  %v245_v33 = vld [vmem:[%s826_s5 + $0x20] sm:$0xff]  ;;  %v244_v41 = vld [vmem:[%s826_s5 + $0x18] sm:$0xff] }
  0x1b   :  { %480 = vmatpush3.msra.mxu1 %v152_v10  ;;  %508 = vmatprep.subr.mxu0 %v255_v23  ;;  %v413_v34 = vld [vmem:[%s823_s2] ss:$0 sm:$0xff]  ;;  %v243_v42 = vld [vmem:[%s826_s5 + $0x10] sm:$0xff]  ;;  %v242_v43 = vld [vmem:[%s826_s5 + $0x8] sm:$0xff] }
  0x1c   :  { %481 = vmatprep.subr.mxu1 %v151_v11  ;;  %509 = vmatpush3.msra.mxu0 %v255_v23  ;;  %v241_v44 = vld [vmem:[%s826_s5] sm:$0xff] }
  0x1d   :  { %482 = vmatpush3.msra.mxu1 %v151_v11  ;;  %510 = vmatprep.subr.mxu0 %v254_v24  ;;  %v416_v45 = vld [vmem:[%s825_s4] ss:$0 sm:$0xff]  ;;  %s632_s4 = smov [#allocation5]  }
  0x1e   :  { %483 = vmatprep.subr.mxu1 %v150_v12  ;;  %511 = vmatpush3.msra.mxu0 %v254_v24  ;;  %v417_v52 = vld [vmem:[%s827_s6] ss:$0 sm:$0xff]  ;;  %s385_s5 = sshll.u32 %s632_s4, 4  ;;  %s633_s6 = smov 112   ;;  %s386_s5 = int_to_ptr.vmem [resolvable:$true] %s385_s5 }
  0x1f   :  { %484 = vmatpush3.msra.mxu1 %v150_v12  ;;  %512 = vmatprep.subr.mxu0 %v253_v25  ;;  %s583_s20 = scalar_lea.vmem %s386_s5, 256  ;;  %p588_p6 = scmp.lt.s32.totalorder %s386_s5, %s386_s5 }
  0x20   :  { %485 = vmatprep.subr.mxu1 %v149_v13  ;;  %513 = vmatpush3.msra.mxu0 %v253_v25  ;;  %p584_p5 = scmp.ne.s32.totalorder %s386_s5, %s583_s20  ;;  %p589_p7 = scmp.lt.s32.totalorder %s583_s20, %s583_s20 }
  0x21   :  { %486 = vmatpush3.msra.mxu1 %v149_v13  ;;  %514 = vmatprep.subr.mxu0 %v252_v26 }
  0x22   :  { %487 = vmatprep.subr.mxu1 %v148_v14  ;;  %515 = vmatpush3.msra.mxu0 %v252_v26  ;;  %p590_p8 = por %p589_p7, %p588_p6 }
  0x23   :  { %488 = vmatpush3.msra.mxu1 %v148_v14  ;;  %516 = vmatprep.subr.mxu0 %v251_v27 }
  0x24   :  { %489 = vmatprep.subr.mxu1 %v147_v15  ;;  %517 = vmatpush3.msra.mxu0 %v251_v27  ;;  %p591_p9 = pnand %p590_p8, %p584_p5 }
  0x25   :  { %490 = vmatpush3.msra.mxu1 %v147_v15  ;;  %518 = vmatprep.subr.mxu0 %v250_v28 }
  0x26   :  { %491 = vmatprep.subr.mxu1 %v146_v16  ;;  %519 = vmatpush3.msra.mxu0 %v250_v28 }
  0x27   :  { %492 = vmatpush3.msra.mxu1 %v146_v16  ;;  %520 = vmatprep.subr.mxu0 %v249_v29 }
  0x28   :  { %493 = vmatprep.subr.mxu1 %v145_v17  ;;  %521 = vmatpush3.msra.mxu0 %v249_v29 }
  0x29   :  { %494 = vmatpush3.msra.mxu1 %v145_v17  ;;  %522 = vmatprep.subr.mxu0 %v248_v30 }
  0x2a   :  { %495 = vmatprep.subr.mxu1 %v144_v18  ;;  %523 = vmatpush3.msra.mxu0 %v248_v30 }
  0x2b   :  { %496 = vmatpush3.msra.mxu1 %v144_v18  ;;  %524 = vmatprep.subr.mxu0 %v247_v31 }
  0x2c   :  { %497 = vmatprep.subr.mxu1 %v143_v19  ;;  %525 = vmatpush3.msra.mxu0 %v247_v31 }
  0x2d   :  { %498 = vmatpush3.msra.mxu1 %v143_v19  ;;  %526 = vmatprep.subr.mxu0 %v246_v32 }
  0x2e   :  { %499 = vmatprep.subr.mxu1 %v142_v20  ;;  %527 = vmatpush3.msra.mxu0 %v246_v32 }
  0x2f   :  { %500 = vmatpush3.msra.mxu1 %v142_v20  ;;  %528 = vmatprep.subr.mxu0 %v245_v33 }
  0x30   :  { %501 = vmatprep.subr.mxu1 %v141_v21  ;;  %529 = vmatpush3.msra.mxu0 %v245_v33 }
  0x31   :  { %502 = vmatpush3.msra.mxu1 %v141_v21  ;;  %530 = vmatprep.subr.mxu0 %v244_v41 }
  0x32   :  { %531 = vmatpush3.msra.mxu0 %v244_v41 }
  0x33   :  { %532 = vmatprep.subr.mxu0 %v243_v42 }
  0x34   :  { %533 = vmatpush3.msra.mxu0 %v243_v42 }
  0x35   :  { %534 = vmatprep.subr.mxu0 %v242_v43 }
  0x36   :  { %535 = vmatpush3.msra.mxu0 %v242_v43 }
  0x37   :  { %536 = vmatprep.subr.mxu0 %v241_v44 }
  0x38   :  { %537 = vmatpush3.msra.mxu0 %v241_v44 }
  0xd8   :  { %v470_v35 = vpop.f32.mrf.mxu0 }
  0xd9   :  { %v136_v36 = vadd.f32 %v470_v35, %v413_v34 }
  0xda   :  { %v130_v37 = vpop.f32.mrf.mxu0 }
  0xdb   :  { %v131_v38 = vadd.f32 %v413_v34, %v130_v37  ;;  %v140_v40 = vmax.f32 %v136_v36, 0.0 }
  0xdd   :  { %v139_v39 = vmax.f32 %v131_v38, 0.0 }
  0xdf   :  { %503 = vmatprep.mubr.f32.mxu1 %v139_v39 }
  0xe0   :  { %504 = vmatmul.mubr.f32.vlgmr.msra.gmra.mxu1 %v140_v40 }
 0x1a0   :  { %v505_v46 = vpop.f32.mrf.mxu1 }
 0x1a1   :  { %v236_v47 = vadd.f32 %v505_v46, %v416_v45 }
 0x1a2   :  { %v230_v48 = vpop.f32.mrf.mxu1 }
 0x1a3   :  { %v231_v49 = vadd.f32 %v416_v45, %v230_v48  ;;  %v240_v51 = vmax.f32 %v236_v47, 0.0 }
 0x1a5   :  { %v239_v50 = vmax.f32 %v231_v49, 0.0 }
 0x1a7   :  { %538 = vmatprep.mubr.f32.mxu0 %v239_v50 }
 0x1a8   :  { %539 = vmatmul.mubr.f32.vlgmr.msra.gmra.mxu0 %v240_v51 }
 0x268   :  { %v540_v53 = vpop.f32.mrf.mxu0 }
 0x269   :  { %v336_v54 = vadd.f32 %v540_v53, %v417_v52 }
 0x26a   :  { %v330_v55 = vpop.f32.mrf.mxu0 }
 0x26b   :  { %v340_v56 = vmin.f32 %v336_v54, 20.0  ;;  %v359_v57 = vsub.f32 0.0, %v336_v54  ;;  %v331_v58 = vadd.f32 %v417_v52, %v330_v55  ;;  %vm346_vm2 = vcmp.gt.f32.partialorder %v336_v54, 20.0 }
 0x26d   :  { %v343_v59 = vmul.f32 1.442695, %v340_v56  ;;  %v362_v60 = vmul.f32 1.442695, %v359_v57  ;;  %v339_v61 = vmin.f32 %v331_v58, 20.0  ;;  %v358_v62 = vsub.f32 0.0, %v331_v58 }
 0x26e   :  { %vm345_vm3 = vcmp.gt.f32.partialorder %v331_v58, 20.0 }
 0x26f   :  { %547 = vpow2.f32 %v343_v59  ;;  %v341_v63 = vmul.f32 1.442695, %v339_v61  ;;  %v360_v0 = vmul.f32 1.442695, %v358_v62 }
 0x270   :  { %549 = vpow2.f32 %v362_v60 }
 0x271   :  { %551 = vpow2.f32 %v341_v63 }
 0x272   :  { %553 = vpow2.f32 %v360_v0 }
 0x27c   :  { %v548_v1 = vpop.eup %547 }
 0x27d   :  { %v550_v2 = vpop.eup %549  ;;  %v348_v3 = vadd.f32 1.0, %v548_v1 }
 0x27e   :  { %v552_v4 = vpop.eup %551  ;;  %v365_v8 = vadd.f32 1.0, %v550_v2 }
 0x27f   :  { %v554_v5 = vpop.eup %553  ;;  %555 = vlog2.f32 %v348_v3  ;;  %v347_v6 = vadd.f32 1.0, %v552_v4 }
 0x280   :  { %v364_v7 = vadd.f32 1.0, %v554_v5 }
 0x281   :  { %557 = vlog2.f32 %v347_v6 }
 0x282   :  { %559 = vrcp.f32 %v364_v7 }
 0x283   :  { %561 = vrcp.f32 %v365_v8 }
 0x28c   :  { %v556_v9 = vpop.eup %555 }
 0x28d   :  { %v352_v10 = vmul.f32 0.6931472, %v556_v9 }
 0x28e   :  { %v558_v11 = vpop.eup %557 }
 0x28f   :  { %v560_v12 = vpop.eup %559  ;;  %v350_v13 = vmul.f32 0.6931472, %v558_v11  ;;  %v354_v14 = vsel %vm346_vm2, %v336_v54, %v352_v10 }
 0x290   :  { %372 = vrot.lane.b32.xlu0 %v560_v12, %s633_s6  ;;  %357 = vst.msk [vmem:[#allocation5 + $0x8] sm:$0xff] %vm355_vm1, %v354_v14  ;;  %v562_v16 = vpop.eup %561 }
 0x291   :  { %v353_v15 = vsel %vm345_vm3, %v331_v58, %v350_v13 }
 0x292   :  { %356 = vst.msk [vmem:[#allocation5] sm:$0xff] %vm355_vm1, %v353_v15 }
 0x293   :  { %594 = shalt.err (!%p591_p9)
}
 0x294   :  { %391 = dma.vmem_to_hbm [thread:$0]  %s386_s5, 256, %s828_s7, [#allocation4], %s630_s30, %s630_s30, %s631_s9  }
 0x295   :  { %374 = vrot.lane.b32.xlu0 %v562_v16, %s633_s6  ;;  %s634_s23 = smov [#allocation6]  }
 0x296   :  { %s397_s24 = sshll.u32 %s634_s23, 4  ;;  %s398_s24 = int_to_ptr.vmem [resolvable:$true] %s397_s24 }
 0x297   :  { %s603_s25 = scalar_lea.vmem %s398_s24, 256  ;;  %p608_p11 = scmp.lt.s32.totalorder %s398_s24, %s398_s24 }
 0x298   :  { %p604_p10 = scmp.ne.s32.totalorder %s398_s24, %s603_s25  ;;  %p609_p12 = scmp.lt.s32.totalorder %s603_s25, %s603_s25 }
 0x29a   :  { %p610_p13 = por %p609_p12, %p608_p11 }
 0x29c   :  { %p611_p0 = pnand %p610_p13, %p604_p10 }
 0x302   :  { %v373_v17 = vpop.permute.xlu0 %372 }
 0x303   :  { %378 = vst.msk [vmem:[#allocation6] sm:$0xff] %vm355_vm1, %v373_v17 }
 0x307   :  { %v375_v18 = vpop.permute.xlu0 %374 }
 0x308   :  { %379 = vst.msk [vmem:[#allocation6 + $0x8] sm:$0xff] %vm355_vm1, %v375_v18 }
 0x309   :  { %614 = shalt.err (!%p611_p0)
}
 0x30a   :  { %403 = dma.vmem_to_hbm [thread:$0]  %s398_s24, 256, %s829_s8, [#allocation7], %s630_s30, %s630_s30, %s631_s9  }
 0x30b   :  { %625 = dma.done.wait [#allocation4], 256  }
 0x30c   :  { %626 = vsyncadd [#allocation4], 4294967040 }
 0x30d   :  { %627 = dma.done.wait [#allocation7], 256  }
 0x30e   :  { %628 = vsyncadd [#allocation7], 4294967040 }
 0x30f   :  { %410 = vsyncpa [#allocation3], 1 }
 0x310   :  { %411 = vsyncpa [#allocation4], 1 }
 0x311   :  { %412 = vsyncpa [#allocation7], 1 }

</bundles_post_ra>
